<compile_context>
chip_gen: v7x
topology: tpu7x:2x2x1
jax: 0.10.0
libtpu: 0.0.40
codegen_flags: <defaults>
</compile_context>

<pallas_src>
import jax
import jax.numpy as jnp
from jax.experimental import pallas as pl
from jax.experimental.pallas import tpu as pltpu


def _mlp_fused_kernel(ids_ref, emb_ref, w1_ref, b1_ref, w2_ref, b2_ref, o_ref):
    """Whole-batch fused MLP forward, single invocation (no grid).

    ids_ref : (B*S, 1) int32   flattened token ids
    emb_ref : (V, E)   f32     embedding table (fully resident in VMEM)
    w1_ref  : (E, H)   bf16    first linear weight, (in, out) layout
    b1_ref  : (1, H)   f32
    w2_ref  : (H, Cp)  bf16    second linear weight, n_class zero-padded to Cp
    b2_ref  : (1, Cp)  f32
    o_ref   : (B, Cp)  f32     lane-dense output slab (sliced to C outside)
    """
    BS = ids_ref.shape[0]
    V = emb_ref.shape[0]
    B = o_ref.shape[0]
    S = BS // B

    # ---- Embedding gather fused as a one-hot matmul on the MXU -------------
    ids = ids_ref[...]                                               # (BS, 1)
    vocab_iota = jax.lax.broadcasted_iota(jnp.int32, (BS, V), 1)
    onehot = (vocab_iota == ids).astype(jnp.float32)                 # (BS, V)
    x = jnp.dot(onehot, emb_ref[...],
                preferred_element_type=jnp.float32)                  # (BS, E)

    # ---- Hidden layer: bf16 MXU operands, f32 accumulation -----------------
    h = jnp.dot(x.astype(jnp.bfloat16), w1_ref[...],
                preferred_element_type=jnp.float32)                  # (BS, H)
    h = jnp.maximum(h + b1_ref[...], 0.0)                            # bias+ReLU in f32

    # permute(0,2,1) + max_pool1d(kernel=S) + squeeze(2)  ==  max over seq axis
    pooled = jnp.max(h.reshape(B, S, h.shape[-1]), axis=1)           # (B, H)

    # ---- Classifier: one batched matmul, lane-dense store ------------------
    out = jnp.dot(pooled.astype(jnp.bfloat16), w2_ref[...],
                  preferred_element_type=jnp.float32)                # (B, Cp)
    o_ref[...] = (out + b2_ref[...]).astype(o_ref.dtype)


def mlp_forward(token_ids, embed_table, w1, b1, w2, b2):
    """token_ids: (B, S) int; returns (B, n_class) float32."""
    B, S = token_ids.shape
    V, E = embed_table.shape
    H = w1.shape[1]
    C = w2.shape[1]

    LANE = 128
    Cp = pl.cdiv(C, LANE) * LANE  # pad n_class to a full lane width

    ids_flat = token_ids.astype(jnp.int32).reshape(B * S, 1)

    # bf16 matmul operands (f32 accumulation in-kernel); biases stay f32.
    w1_bf = w1.astype(jnp.bfloat16)
    w2_p = jnp.zeros((H, Cp), jnp.bfloat16).at[:, :C].set(w2.astype(jnp.bfloat16))
    b1_2d = b1.reshape(1, H).astype(jnp.float32)
    b2_p = jnp.zeros((1, Cp), jnp.float32).at[:, :C].set(b2.reshape(1, C))

    # Single invocation: no grid, every operand is a whole-array VMEM block
    # (total footprint here is a few tens of KiB, far under any VMEM limit).
    out_p = pl.pallas_call(
        _mlp_fused_kernel,
        out_shape=jax.ShapeDtypeStruct((B, Cp), jnp.float32),
    )(ids_flat, embed_table.astype(jnp.float32), w1_bf, b1_2d, w2_p, b2_p)

    return out_p[:, :C]


if __name__ == "__main__":
    # Config (small, consistent with the module)
    vocab_size = 50
    embedding_dim = 32
    hidden_size = 32
    n_class = 2
    B, S = 2, 8

    key = jax.random.PRNGKey(0)
    k_emb, k_w1, k_b1, k_w2, k_b2, k_ids = jax.random.split(key, 6)

    # "pretrained" embedding table (update_w2v=False -> stays as copied)
    embed_table = jax.random.normal(k_emb, (vocab_size, embedding_dim), jnp.float32)

    # Trainable params ~ Normal(0, 0.01), stored as (in, out) = torch (out, in).T
    w1 = 0.01 * jax.random.normal(k_w1, (embedding_dim, hidden_size), jnp.float32)
    b1 = 0.01 * jax.random.normal(k_b1, (hidden_size,), jnp.float32)
    w2 = 0.01 * jax.random.normal(k_w2, (hidden_size, n_class), jnp.float32)
    b2 = 0.01 * jax.random.normal(k_b2, (n_class,), jnp.float32)

    token_ids = jax.random.randint(k_ids, (B, S), 0, vocab_size, jnp.int32)

    out = mlp_forward(token_ids, embed_table, w1, b1, w2, b2)
    jax.block_until_ready(out)

    # Reference in plain JAX using the same bf16-operand / f32-accumulate recipe.
    x_emb = jnp.take(embed_table, token_ids, axis=0)                       # (B, S, E)
    h_ref = jnp.maximum(
        jnp.dot(x_emb.reshape(B * S, embedding_dim).astype(jnp.bfloat16),
                w1.astype(jnp.bfloat16),
                preferred_element_type=jnp.float32) + b1, 0.0)             # (B*S, H)
    pooled_ref = jnp.max(h_ref.reshape(B, S, hidden_size), axis=1)         # (B, H)
    ref = jnp.dot(pooled_ref.astype(jnp.bfloat16), w2.astype(jnp.bfloat16),
                  preferred_element_type=jnp.float32) + b2                 # (B, C)

    assert out.shape == (B, n_class)
    assert jnp.allclose(out, ref, atol=1e-3, rtol=1e-3), (out, ref)

    print("KERNEL_OK")
</pallas_src>

<mosaic_0001>
module attributes {stable_mosaic.version = 11 : i64} {
  func.func @_mlp_fused_kernel(%arg0: memref<16x1xi32, #tpu.memory_space<vmem>>, %arg1: memref<50x32xf32, #tpu.memory_space<vmem>>, %arg2: memref<32x32xbf16, #tpu.memory_space<vmem>>, %arg3: memref<1x32xf32, #tpu.memory_space<vmem>>, %arg4: memref<32x128xbf16, #tpu.memory_space<vmem>>, %arg5: memref<1x128xf32, #tpu.memory_space<vmem>>, %arg6: memref<2x128xf32, #tpu.memory_space<vmem>>) attributes {dimension_semantics = [], scalar_prefetch = 0 : i64, scratch_operands = 0 : i64, tpu.core_type = #tpu.core_type<tc>} {
    %c0 = arith.constant 0 : index
    %c0_0 = arith.constant 0 : index
    %0 = vector.load %arg0[%c0, %c0_0] : memref<16x1xi32, #tpu.memory_space<vmem>>, vector<16x1xi32>
    %1 = tpu.iota {dimensions = array<i32: 1>} : vector<16x50xi32>
    %2 = vector.broadcast %0 : vector<16x1xi32> to vector<16x50xi32>
    %3 = arith.cmpi eq, %1, %2 : vector<16x50xi32>
    %4 = arith.extui %3 : vector<16x50xi1> to vector<16x50xi32>
    %5 = arith.sitofp %4 : vector<16x50xi32> to vector<16x50xf32>
    %c0_1 = arith.constant 0 : index
    %c0_2 = arith.constant 0 : index
    %6 = vector.load %arg1[%c0_1, %c0_2] : memref<50x32xf32, #tpu.memory_space<vmem>>, vector<50x32xf32>
    %cst = arith.constant dense<0.000000e+00> : vector<16x32xf32>
    %7 = tpu.matmul %5, %6, %cst {dimension_numbers = #tpu.dot_dimension_numbers<[1], [0], [0], [1], [0, 0, 1, 1], [], []>} : vector<16x50xf32>, vector<50x32xf32>, vector<16x32xf32> -> vector<16x32xf32>
    %8 = arith.truncf %7 : vector<16x32xf32> to vector<16x32xbf16>
    %c0_3 = arith.constant 0 : index
    %c0_4 = arith.constant 0 : index
    %9 = vector.load %arg2[%c0_3, %c0_4] : memref<32x32xbf16, #tpu.memory_space<vmem>>, vector<32x32xbf16>
    %cst_5 = arith.constant dense<0.000000e+00> : vector<16x32xf32>
    %10 = tpu.matmul %8, %9, %cst_5 {dimension_numbers = #tpu.dot_dimension_numbers<[1], [0], [0], [1], [0, 0, 1, 1], [], []>} : vector<16x32xbf16>, vector<32x32xbf16>, vector<16x32xf32> -> vector<16x32xf32>
    %c0_6 = arith.constant 0 : index
    %c0_7 = arith.constant 0 : index
    %11 = vector.load %arg3[%c0_6, %c0_7] : memref<1x32xf32, #tpu.memory_space<vmem>>, vector<1x32xf32>
    %12 = vector.broadcast %11 : vector<1x32xf32> to vector<16x32xf32>
    %13 = arith.addf %10, %12 : vector<16x32xf32>
    %cst_8 = arith.constant 0.000000e+00 : f32
    %14 = vector.broadcast %cst_8 : f32 to vector<16x32xf32>
    %15 = arith.maximumf %13, %14 : vector<16x32xf32>
    %16 = vector.shape_cast %15 : vector<16x32xf32> to vector<2x8x32xf32>
    %cst_9 = arith.constant dense<0xFF800000> : vector<2x32xf32>
    %17 = vector.multi_reduction <maximumf>, %16, %cst_9 [1] : vector<2x8x32xf32> to vector<2x32xf32>
    %18 = arith.truncf %17 : vector<2x32xf32> to vector<2x32xbf16>
    %c0_10 = arith.constant 0 : index
    %c0_11 = arith.constant 0 : index
    %19 = vector.load %arg4[%c0_10, %c0_11] : memref<32x128xbf16, #tpu.memory_space<vmem>>, vector<32x128xbf16>
    %cst_12 = arith.constant dense<0.000000e+00> : vector<2x128xf32>
    %20 = tpu.matmul %18, %19, %cst_12 {dimension_numbers = #tpu.dot_dimension_numbers<[1], [0], [0], [1], [0, 0, 1, 1], [], []>} : vector<2x32xbf16>, vector<32x128xbf16>, vector<2x128xf32> -> vector<2x128xf32>
    %c0_13 = arith.constant 0 : index
    %c0_14 = arith.constant 0 : index
    %21 = vector.load %arg5[%c0_13, %c0_14] : memref<1x128xf32, #tpu.memory_space<vmem>>, vector<1x128xf32>
    %22 = vector.broadcast %21 : vector<1x128xf32> to vector<2x128xf32>
    %23 = arith.addf %20, %22 : vector<2x128xf32>
    %c0_15 = arith.constant 0 : index
    %c0_16 = arith.constant 0 : index
    %24 = vector.load %arg6[%c0_15, %c0_16] : memref<2x128xf32, #tpu.memory_space<vmem>>, vector<2x128xf32>
    tpu.vector_store %arg6[%c0_15, %c0_16], %23 {strides = array<i32>} : memref<2x128xf32, #tpu.memory_space<vmem>>, vector<2x128xf32>,
    return
  }
}

</mosaic_0001>

<bundles_post_ra>
// kernel: tpu_custom_call.1
= control target key start
LH: loop header
LB: loop body
LE: loop exit
PB: predicated region body
PF: predicated region fallthrough
CT: control target
= control target key end

     0   :  { %v415_v2 = vmov 0   ;;  %v416_v11 = vmov 0.0   ;;  %s515_s0 = inlined_call_operand.vmem [shape: s32[16,1], index: 0, kind: input, shape index: {}]   ;;  %s516_s1 = inlined_call_operand.vmem [shape: f32[50,32], index: 1, kind: input, shape index: {}]   ;;  %s517_s2 = inlined_call_operand.vmem [shape: bf16[32,32], index: 2, kind: input, shape index: {}]   ;;  %s518_s3 = inlined_call_operand.vmem [shape: f32[1,32], index: 3, kind: input, shape index: {}]   ;;  %s519_s4 = inlined_call_operand.vmem [shape: bf16[32,128], index: 4, kind: input, shape index: {}]   ;;  %s520_s5 = inlined_call_operand.vmem [shape: f32[1,128], index: 5, kind: input, shape index: {}]   ;;  %s521_s6 = inlined_call_operand.hbm [shape: f32[2,128], index: 6, kind: output, shape index: {}]  }
   0x1   :  { %v25_v0 = vld [vmem:[%s515_s0] sm:$0xff]  ;;  %386 = vset.pattern.permute.xlu0 %v415_v2  ;;  %v42_v3 = vld [vmem:[%s516_s1 + $0x8] sm:$0xff]  ;;  %v43_v4 = vld [vmem:[%s516_s1 + $0x10] sm:$0xff]  ;;  %354 = vmatprep.subr.bf16.mxu1 %v416_v11 }
   0x2   :  { %v41_v1 = vld [vmem:[%s516_s1] sm:$0xff]  ;;  %v44_v5 = vld [vmem:[%s516_s1 + $0x18] sm:$0xff]  ;;  %30 = vperm.xlu0 %386, %v25_v0   ;;  %v26_v6 = vld [vmem:[%s515_s0 + $0x8] sm:$0xff] }
   0x3   :  { %v370_v7 = vpack.c.bf16 %v42_v3, %v41_v1  ;;  %v374_v8 = vpack.c.bf16 %v44_v5, %v43_v4  ;;  %v45_v9 = vld [vmem:[%s516_s1 + $0x20] sm:$0xff]  ;;  %v46_v10 = vld [vmem:[%s516_s1 + $0x28] sm:$0xff] }
   0x4   :  { %v378_v12 = vpack.c.bf16 %v46_v10, %v45_v9 }
   0x5   :  { %371 = vmatprep.subr.bf16.mxu0 %v370_v7 }
   0x6   :  { %373 = vmatpush3.bf16.msra.mxu0 %v370_v7  ;;  %33 = vperm.xlu0 %386, %v26_v6  }
   0x7   :  { %375 = vmatprep.subr.bf16.mxu0 %v374_v8 }
   0x8   :  { %11 = vsyncpa [#allocation3], 0  ;;  %v387_v13 = vld [vmem:[%s517_s2] sm:$0xff]   ;;  %v47_v14 = vld [vmem:[%s516_s1 + $0x30] sm:$0x3]  ;;  %vm55_vm0 = vcmask 1041408   ;;  %v27_v15 = vlaneseq }
   0x9   :  { %355 = vmatpush3.bf16.msra.mxu1 %v387_v13  ;;  %vm48_vm1 = vcmask 408576   ;;  %v388_v21 = vld [vmem:[%s517_s2 + $0x8] sm:$0xff]   ;;  %vm417_vm4 = vmmov 0   ;;  %vm158_vm5 = vcmask 261120   ;;  %v389_v25 = vld [vmem:[%s519_s4] sm:$0xff]   ;;  %vm236_vm6 = vcmask 1041409  }
   0xa   :  { %377 = vmatpush3.bf16.msra.mxu0 %v374_v8  ;;  %356 = vmatprep.subr.bf16.mxu1 %v416_v11  ;;  %v28_v16 = vand.u32 127, %v27_v15  ;;  %v390_v26 = vld [vmem:[%s519_s4 + $0x8] sm:$0xff]   ;;  %v314_v27 = vld [vmem:[%s518_s3] ss:$0 sm:$0xff]  ;;  %s418_s22 = smov [#allocation2]  }
   0xb   :  { %379 = vmatprep.subr.bf16.mxu0 %v378_v12  ;;  %358 = vmatprep.mubr.msk.bf16.mxu1 %vm417_vm4, %v416_v11  ;;  %v318_v56 = vld [vmem:[%s520_s5] ss:$0 sm:$0xff]  ;;  %s301_s23 = sshll.u32 %s418_s22, 4  ;;  %s302_s23 = int_to_ptr.vmem [resolvable:$true] %s301_s23 }
   0xc   :  { %s391_s24 = scalar_lea.vmem %s302_s23, 32  ;;  %p396_p1 = scmp.lt.s32.totalorder %s302_s23, %s302_s23 }
   0xd   :  { %357 = vmatpush3.bf16.msra.mxu1 %v388_v21  ;;  %p392_p0 = scmp.ne.s32.totalorder %s302_s23, %s391_s24  ;;  %p397_p2 = scmp.lt.s32.totalorder %s391_s24, %s391_s24 }
   0xe   :  { %381 = vmatpush3.bf16.msra.mxu0 %v378_v12  ;;  %362 = vmatprep.subr.bf16.mxu1 %v416_v11 }
   0xf   :  { %349 = vmatprep.subr.msk.mxu0 %vm55_vm0, %v47_v14  ;;  %p398_p3 = por %p397_p2, %p396_p1 }
  0x11   :  { %p399_p4 = pnand %p398_p3, %p392_p0 }
  0x12   :  { %350 = vmatpush3.msk.msra.mxu0 %vm55_vm0, %v47_v14 }
  0x81   :  { %v31_v17 = vpop.permute.xlu0 %30 }
  0x82   :  { %vm35_vm2 = vcmp.eq.s32.totalorder %v28_v16, %v31_v17 }
  0x83   :  { %v309_v18 = vsel %vm35_vm2, 1.0, %v416_v11 }
  0x84   :  { %351 = vmatprep.mubr.msk.f32.mxu0 %vm48_vm1, %v309_v18 }
  0x85   :  { %v34_v19 = vpop.permute.xlu0 %33 }
  0x86   :  { %vm36_vm3 = vcmp.eq.s32.totalorder %v28_v16, %v34_v19 }
  0x87   :  { %v310_v20 = vsel %vm36_vm3, 1.0, %v416_v11 }
  0x88   :  { %352 = vmatmul.mubr.msk.f32.vlgmr.msra.gmra.mrb[0].mxu0 %vm48_vm1, %v310_v20 }
 0x15b   :  { %v353_v22 = vpop.f32.mrb[0].mxu0 }
 0x15c   :  { %v125_v23 = vpop.f32.mrb[1].mxu0 }
 0x15d   :  { %v134_v24 = vpack.c.bf16 %v353_v22, %v125_v23 }
 0x15f   :  { %359 = vmatmul.mubr.msk.bf16.vlgmr.msra.gmra.mrb[0].mxu1 %vm158_vm5, %v134_v24 }
 0x160   :  { %366 = vmatprep.mubr.msk.bf16.mxu1 %vm417_vm4, %v416_v11  ;;  %363 = vmatpush3.bf16.msra.mxu1 %v389_v25 }
 0x161   :  { %364 = vmatprep.subr.bf16.mxu1 %v416_v11 }
 0x164   :  { %365 = vmatpush3.bf16.msra.mxu1 %v390_v26 }
 0x232   :  { %v196_v28 = vpop.f32.mrb[0].mxu1 }
 0x233   :  { %v197_v29 = vadd.f32 %v314_v27, %v196_v28  ;;  %v360_v30 = vpop.f32.mrb[1].mxu1 }
 0x234   :  { %v199_v31 = vpop.f32.mrb[2].mxu1 }
 0x235   :  { %v203_v32 = vmax.f32 %v197_v29, 0.0  ;;  %v200_v33 = vadd.f32 %v314_v27, %v199_v31  ;;  %v361_v34 = vpop.f32.mrb[3].mxu1 }
 0x237   :  { %v205_v35 = vsel %vm158_vm5, %v203_v32, -inf  ;;  %v204_v36 = vmax.f32 %v200_v33, 0.0 }
 0x238   :  { %v206_v37 = vrot.slane %v205_v35, 4 }
 0x239   :  { %v212_v38 = vsel %vm158_vm5, %v204_v36, -inf }
 0x23a   :  { %v207_v39 = vmax.f32 %v205_v35, %v206_v37  ;;  %v213_v40 = vrot.slane %v212_v38, 4 }
 0x23c   :  { %v208_v41 = vrot.slane %v207_v39, 2  ;;  %v214_v42 = vmax.f32 %v212_v38, %v213_v40 }
 0x23e   :  { %v209_v43 = vmax.f32 %v207_v39, %v208_v41  ;;  %v215_v44 = vrot.slane %v214_v42, 2 }
 0x240   :  { %v210_v45 = vrot.slane %v209_v43, 1  ;;  %v216_v46 = vmax.f32 %v214_v42, %v215_v44 }
 0x242   :  { %v211_v47 = vmax.f32 %v209_v43, %v210_v45  ;;  %v217_v48 = vrot.slane %v216_v46, 1 }
 0x244   :  { %v219_v49 = vpack.c.bf16 %v211_v47, %v211_v47  ;;  %v218_v50 = vmax.f32 %v216_v46, %v217_v48 }
 0x246   :  { %v220_v51 = vpack.c.bf16 %v218_v50, %v218_v50  ;;  %v234_v52 = vunpack.c.l.b16 %v219_v49 }
 0x248   :  { %v235_v53 = vunpack.c.l.b16 %v220_v51 }
 0x24a   :  { %v237_v54 = vsel %vm236_vm6, %v235_v53, %v234_v52 }
 0x24b   :  { %v238_v55 = vpack.c.b16 %v237_v54, %v237_v54 }
 0x24d   :  { %367 = vmatmul.mubr.msk.bf16.vlgmr.msra.gmra.mrb[4].mxu1 %vm158_vm5, %v238_v55 }
 0x320   :  { %v288_v57 = vpop.f32.mrb[4].mxu1 }
 0x321   :  { %v289_v58 = vadd.f32 %v318_v56, %v288_v57  ;;  %v368_v59 = vpop.f32.mrb[5].mxu1 }
 0x322   :  { %v291_v60 = vpop.f32.mrb[6].mxu1 }
 0x323   :  { %294 = vst [vmem:[#allocation2] sm:$0x3] %v289_v58  ;;  %v369_v61 = vpop.f32.mrb[7].mxu1 }
 0x324   :  { %402 = shalt.err (!%p399_p4)
}
 0x325   :  { %s403_s5 = scalar_lea.hbm %s521_s6, 32 }
 0x326   :  { %p404_p5 = scmp.ne.s32.totalorder %s521_s6, %s403_s5  ;;  %p407_p6 = scmp.lt.u32.totalorder %s403_s5, %s521_s6 }
 0x328   :  { %p409_p7 = pnand %p407_p6, %p404_p5 }
 0x32a   :  { %412 = shalt.err (!%p409_p7)
}
 0x32b   :  { %304 = dma.vmem_to_hbm [thread:$0]  %s302_s23, 32, %s521_s6, [#allocation3]  }
 0x32c   :  { %413 = dma.done.wait [#allocation3], 32  }
 0x32d   :  { %414 = vsyncadd [#allocation3], 4294967264 }
 0x32e   :  { %308 = vsyncpa [#allocation3], 1 }

</bundles_post_ra>
